<compile_context>
chip_gen: v6e
topology: v6e:2x2x1
jax: 0.10.0
libtpu: 0.0.40
codegen_flags: <defaults>
</compile_context>

<pallas_src>
import functools
import math

import jax
import jax.numpy as jnp
from jax import lax
from jax.experimental import pallas as pl
from jax.experimental.pallas import tpu as pltpu

NEG_INF = -1e30  # large finite negative: avoids inf-inf NaNs in online softmax


# ----------------------------------------------------------------------------
# helpers
# ----------------------------------------------------------------------------
def _round_up(x, m):
    return ((x + m - 1) // m) * m


def _sublane_min(dtype):
    """Minimum second-to-last-dim tile for a dtype (8 f32 / 16 bf16 / 32 int8)."""
    return {4: 8, 2: 16, 1: 32}.get(jnp.dtype(dtype).itemsize, 8)


def _pick_tile(dim, pref, align):
    """Tile that is a multiple of `align`, at most ~pref; the array is padded to it."""
    pref = max(align, (pref // align) * align)
    return min(pref, _round_up(dim, align))


# ----------------------------------------------------------------------------
# 1) `Matmul.forward(x, y)` == torch.matmul(x, y): tiled batched matmul.
# ----------------------------------------------------------------------------
def _matmul_kernel(*refs, k_axis, nk):
    if nk == 1:
        x_ref, y_ref, o_ref = refs
        o_ref[...] = jnp.dot(x_ref[...], y_ref[...],
                             preferred_element_type=jnp.float32).astype(o_ref.dtype)
        return

    x_ref, y_ref, o_ref, acc_ref = refs
    k = pl.program_id(k_axis)
    prod = jnp.dot(x_ref[...], y_ref[...], preferred_element_type=jnp.float32)

    @pl.when(k == 0)
    def _():
        acc_ref[...] = prod          # direct write: no zero-store + reload

    @pl.when(k != 0)
    def _():
        acc_ref[...] += prod

    @pl.when(k == nk - 1)
    def _():
        o_ref[...] = acc_ref[...].astype(o_ref.dtype)


def matmul(x, y, *, tm=512, tn=512, tk=512):
    """Pallas equivalent of Matmul.forward: torch.matmul(x, y) for >=2-D operands.

    Shared (broadcast) operands are NOT materialized: singleton batch dims are
    resolved in the BlockSpec index_map, so a shared weight is streamed once.
    """
    # TODO(synk): 1-D operand cases of torch.matmul (vec @ mat, mat @ vec) not implemented.
    assert x.ndim >= 2 and y.ndim >= 2
    M, K = x.shape[-2:]
    K2, N = y.shape[-2:]
    assert K == K2, "inner dimensions must match"
    # TODO(synk): if int8 operands are ever fed on v7x, pre-cast to bf16/fp8 (no int MXU).

    bshape = tuple(int(d) for d in jnp.broadcast_shapes(x.shape[:-2], y.shape[:-2]))
    nb = len(bshape)
    x_bdims = (1,) * (nb - (x.ndim - 2)) + tuple(x.shape[:-2])
    y_bdims = (1,) * (nb - (y.ndim - 2)) + tuple(y.shape[:-2])

    out_dtype = jnp.result_type(x.dtype, y.dtype)

    # Lane dims (tk for x, tn for y/out) are 128-aligned; the sublane dim tm is
    # dtype-aware but prefers 128-multiples so the 256x256 MXUs (v6e/v7x) are well
    # fed.  Defaults (512,512,512) fit the default scoped-VMEM on every generation
    # (v5e 16 MiB scoped, v6e 32 MiB, v7x 64 MiB physical); on v6e/v7x callers may
    # pass tn=1024 for ~2x arithmetic intensity on large matmuls.
    m_align = 128 if M >= 128 else max(_sublane_min(x.dtype), _sublane_min(out_dtype))
    tm = _pick_tile(M, tm, m_align)
    tn = _pick_tile(N, tn, 128)
    tk = _pick_tile(K, tk, 128)
    Mp, Np, Kp = _round_up(M, tm), _round_up(N, tn), _round_up(K, tk)

    # Free reshapes to carry explicit (possibly singleton) batch dims; zero-pad
    # ragged tails (zeros along K do not change the product).
    x2 = x.reshape(x_bdims + (M, K))
    y2 = y.reshape(y_bdims + (K, N))
    if (Mp, Kp) != (M, K):
        x2 = jnp.pad(x2, [(0, 0)] * nb + [(0, Mp - M), (0, Kp - K)])
    if (Kp, Np) != (K, N):
        y2 = jnp.pad(y2, [(0, 0)] * nb + [(0, Kp - K), (0, Np - N)])

    grid = bshape + (Mp // tm, Np // tn, Kp // tk)     # reduction axis last
    nk = Kp // tk

    def _index_map(op_bdims, tail):
        def index_map(*idx):
            batch = tuple(idx[d] if op_bdims[d] != 1 else 0 for d in range(nb))
            return batch + tuple(idx[nb + t] for t in tail)
        return index_map

    # TODO(synk): add pipeline_mode=pl.Buffered(3) on the inputs only if profiles
    # show exposed DMA on the K axis after the tile enlargement.
    in_specs = [
        pl.BlockSpec((None,) * nb + (tm, tk), _index_map(x_bdims, (0, 2))),
        pl.BlockSpec((None,) * nb + (tk, tn), _index_map(y_bdims, (2, 1))),
    ]
    out_spec = pl.BlockSpec((None,) * nb + (tm, tn), _index_map(bshape, (0, 1)))

    kernel = functools.partial(_matmul_kernel, k_axis=nb + 2, nk=nk)
    scratch = [pltpu.VMEM((tm, tn), jnp.float32)] if nk > 1 else []

    out = pl.pallas_call(
        kernel,
        out_shape=jax.ShapeDtypeStruct(bshape + (Mp, Np), out_dtype),
        grid_spec=pltpu.PrefetchScalarGridSpec(
            num_scalar_prefetch=0,
            grid=grid,
            in_specs=in_specs,
            out_specs=out_spec,
            scratch_shapes=scratch,
        ),
        compiler_params=pltpu.CompilerParams(
            dimension_semantics=("parallel",) * (nb + 2) + ("arbitrary",)),
    )(x2, y2)
    if (Mp, Np) != (M, N):
        out = out[..., :M, :N]
    return out


# ----------------------------------------------------------------------------
# 2) Fused SDPA (the attention that consumes the Matmul wrappers in gemma):
#    out = softmax(Q @ K^T * scale + mask [+ causal]) @ V, flash-style.
# ----------------------------------------------------------------------------
def _sdpa_kernel(*refs, scale, causal, tq, tk, has_mask):
    if has_mask:
        q_ref, k_ref, v_ref, mask_ref, o_ref, m_sc, l_sc, acc_sc = refs
    else:
        q_ref, k_ref, v_ref, o_ref, m_sc, l_sc, acc_sc = refs
        mask_ref = None

    # program_id is read ONLY at the top level (never inside a pl.when body) and
    # captured by the closures below — required for clean lowering.
    qi = pl.program_id(1)
    ki = pl.program_id(2)
    nk = pl.num_programs(2)

    @pl.when(ki == 0)
    def _():
        m_sc[...] = jnp.full_like(m_sc, NEG_INF)
        l_sc[...] = jnp.zeros_like(l_sc)
        acc_sc[...] = jnp.zeros_like(acc_sc)

    def compute(apply_causal_mask):
        # Native-dtype MXU operands; scale folded into q (tq x D, not tq x tk).
        q = q_ref[0] * scale                 # (tq, D)
        k = k_ref[0]                         # (tk, D)
        v = v_ref[0]                         # (tk, D)

        # QK^T: contract the D axes directly (no explicit transpose of k).
        s = lax.dot_general(q, k, (((1,), (1,)), ((), ())),
                            preferred_element_type=jnp.float32)   # (tq, tk) f32

        if mask_ref is not None:
            # additive mask streamed in bf16; clamp to a finite large-negative.
            s = s + jnp.maximum(mask_ref[0].astype(jnp.float32), NEG_INF)

        if apply_causal_mask:
            # (tq,1)/(1,tk) iotas broadcast in the compare (cheaper than dense iotas).
            row = qi * tq + lax.broadcasted_iota(jnp.int32, (tq, 1), 0)
            col = ki * tk + lax.broadcasted_iota(jnp.int32, (1, tk), 1)
            s = jnp.where(col <= row, s, NEG_INF)

        # Online softmax kept in f32.
        m_prev = m_sc[...]                                        # (tq, 1)
        m_new = jnp.maximum(m_prev, s.max(axis=-1, keepdims=True))
        alpha = jnp.exp(m_prev - m_new)
        p = jnp.exp(s - m_new)                                    # (tq, tk)

        l_sc[...] = alpha * l_sc[...] + p.sum(axis=-1, keepdims=True)
        acc_sc[...] = alpha * acc_sc[...] + jnp.dot(
            p.astype(v.dtype), v, preferred_element_type=jnp.float32)
        m_sc[...] = m_new

    if causal:
        r0 = qi * tq
        c0 = ki * tk
        all_visible = c0 + (tk - 1) <= r0        # tile fully at/below the diagonal
        any_visible = c0 <= r0 + (tq - 1)        # tile has >=1 visible element
        straddles = jnp.logical_and(any_visible, jnp.logical_not(all_visible))
        # Fully-visible tiles skip the compare/select; fully-masked tiles skip all
        # compute (and their DMA was skipped by the clamped index_maps).
        pl.when(all_visible)(lambda: compute(False))
        pl.when(straddles)(lambda: compute(True))
    else:
        compute(False)

    @pl.when(ki == nk - 1)
    def _():
        # Plain divide: runs once per q tile (negligible) and lowers everywhere.
        o_ref[0] = (acc_sc[...] / l_sc[...]).astype(o_ref.dtype)


def fused_sdpa(query, key, value, attn_mask=None, dropout_p=0.0,
               is_causal=False, scale=None, enable_recompute=False,
               *, tq=256, tk=512):
    """Flash-attention style fused SDPA built from the two attention matmuls."""
    # enable_recompute is an HPU memory-planning hint -> no-op here.
    # TODO(synk): dropout_p > 0 (training-time attention dropout) is not implemented.
    assert dropout_p == 0.0, "dropout not supported in this kernel"

    B, H, Sq, D = query.shape
    _, _, Sk, _ = key.shape
    if scale is None:
        scale = 1.0 / math.sqrt(D)

    tq = min(tq, Sq)
    tk = min(tk, Sk)
    # TODO(synk): pad / mask ragged sequence tails; only exact multiples supported.
    assert Sq % tq == 0 and Sk % tk == 0

    BH = B * H
    q = query.reshape(BH, Sq, D)
    k = key.reshape(BH, Sk, D)
    v = value.reshape(BH, Sk, D)

    if is_causal:
        # Clamp the KV block index to the last block this q tile can see: fully
        # masked grid steps then revisit the previous block, so no new DMA is
        # issued — the causal skip saves HBM traffic as well as compute.
        def _kv_block(qi, ki):
            return jnp.minimum(ki, (qi * tq + tq - 1) // tk)
    else:
        def _kv_block(qi, ki):
            return ki

    has_mask = attn_mask is not None
    inputs = [q, k, v]
    in_specs = [
        pl.BlockSpec((1, tq, D), lambda bh, qi, ki: (bh, qi, 0)),
        pl.BlockSpec((1, tk, D), lambda bh, qi, ki: (bh, _kv_block(qi, ki), 0)),
        pl.BlockSpec((1, tk, D), lambda bh, qi, ki: (bh, _kv_block(qi, ki), 0)),
    ]

    if has_mask:
        m = attn_mask
        if m.ndim == 2:
            m = m[None, None]
        elif m.ndim == 3:
            m = m[:, None]
        mb, mh = m.shape[0], m.shape[1]
        assert mb in (1, B) and mh in (1, H), "mask batch/head dims must be 1 or full"
        if m.dtype == jnp.bool_:
            # torch SDPA boolean semantics: True = keep, False = masked out.
            m = jnp.where(m, 0.0, NEG_INF).astype(jnp.bfloat16)
        elif m.dtype.itemsize > 2:
            # Stream the additive mask in bf16: otherwise it is the largest
            # per-step HBM stream (bigger than K+V combined at D<=128).
            m = m.astype(jnp.bfloat16)
        # Only the Sq/Sk axes are expanded; singleton batch/head axes stay
        # singleton so the mask is never duplicated B- or H-fold in HBM.
        m = jnp.broadcast_to(m, (mb, mh, Sq, Sk)).reshape(mb * mh, Sq, Sk)

        def mask_index(bh, qi, ki):
            b = bh // H if mb == B else 0
            h = bh % H if mh == H else 0
            return (b * mh + h, qi, _kv_block(qi, ki))

        inputs.append(m)
        in_specs.append(pl.BlockSpec((1, tq, tk), mask_index))

    kernel = functools.partial(_sdpa_kernel, scale=float(scale),
                               causal=bool(is_causal), tq=tq, tk=tk,
                               has_mask=has_mask)

    # TODO(synk): for D=64, packing two heads per block (lane-dense 128-wide output)
    # is a further structural option if profiles show vst-slot waste.
    out = pl.pallas_call(
        kernel,
        out_shape=jax.ShapeDtypeStruct((BH, Sq, D), query.dtype),
        grid_spec=pltpu.PrefetchScalarGridSpec(
            num_scalar_prefetch=0,
            grid=(BH, Sq // tq, Sk // tk),
            in_specs=in_specs,
            out_specs=pl.BlockSpec((1, tq, D), lambda bh, qi, ki: (bh, qi, 0)),
            scratch_shapes=[
                pltpu.VMEM((tq, 1), jnp.float32),   # running max m
                pltpu.VMEM((tq, 1), jnp.float32),   # running denom l
                pltpu.VMEM((tq, D), jnp.float32),   # running numerator acc
            ],
        ),
        compiler_params=pltpu.CompilerParams(
            dimension_semantics=("parallel", "parallel", "arbitrary")),
    )(*inputs)
    return out.reshape(B, H, Sq, D)


# ----------------------------------------------------------------------------
# References
# ----------------------------------------------------------------------------
def _reference_sdpa(q, k, v, mask, is_causal, scale):
    qf, kf, vf = (a.astype(jnp.float32) for a in (q, k, v))
    s = jnp.einsum("bhqd,bhkd->bhqk", qf, kf) * scale
    if mask is not None:
        s = s + jnp.broadcast_to(mask.astype(jnp.float32), s.shape)
    if is_causal:
        Sq, Sk = s.shape[-2:]
        tri = jnp.tril(jnp.ones((Sq, Sk), dtype=bool))
        s = jnp.where(tri, s, NEG_INF)
    p = jax.nn.softmax(s, axis=-1)
    return jnp.einsum("bhqk,bhkd->bhqd", p, vf).astype(q.dtype)


if __name__ == "__main__":
    root = jax.random.PRNGKey(0)
    k1, k2, k3, k4, k5, k6 = jax.random.split(root, 6)

    # --- Matmul.forward (torch.matmul) --------------------------------------
    # batched activations @ shared weight (weight streamed once, never duplicated)
    x = jax.random.normal(k1, (2, 4, 16, 32), dtype=jnp.float32)
    w = jax.random.normal(k2, (32, 24), dtype=jnp.float32)
    out_mm = jax.block_until_ready(matmul(x, w))
    ref_mm = jnp.matmul(x, w)
    assert out_mm.shape == ref_mm.shape
    assert jnp.allclose(out_mm, ref_mm, atol=2e-2, rtol=2e-2), (
        float(jnp.max(jnp.abs(out_mm - ref_mm))))

    # mutual batch broadcasting handled by index_maps, not broadcast_to
    xa = jax.random.normal(k3, (2, 1, 16, 32), dtype=jnp.float32)
    yb = jax.random.normal(k4, (1, 4, 32, 24), dtype=jnp.float32)
    out_bc = jax.block_until_ready(matmul(xa, yb))
    ref_bc = jnp.matmul(xa, yb)
    assert out_bc.shape == ref_bc.shape
    assert jnp.allclose(out_bc, ref_bc, atol=2e-2, rtol=2e-2), (
        float(jnp.max(jnp.abs(out_bc - ref_bc))))

    # plain 2-D
    out_2d = jax.block_until_ready(matmul(x[0, 0], w))
    ref_2d = jnp.matmul(x[0, 0], w)
    assert jnp.allclose(out_2d, ref_2d, atol=2e-2, rtol=2e-2)

    # --- Fused SDPA: masked + causal, and mask-free variants ----------------
    B, H, Sq, Sk, D = 2, 2, 256, 256, 64
    q = jax.random.normal(k5, (B, H, Sq, D), dtype=jnp.float32)
    kt = jax.random.normal(k6, (B, H, Sk, D), dtype=jnp.float32)
    v = jax.random.normal(k1, (B, H, Sk, D), dtype=jnp.float32)
    attn_mask = (0.1 * jax.random.normal(k2, (B, 1, Sq, Sk))).astype(jnp.bfloat16)
    scale = 1.0 / math.sqrt(D)

    out1 = jax.block_until_ready(
        fused_sdpa(q, kt, v, attn_mask, dropout_p=0.0, is_causal=True, scale=scale,
                   tq=128, tk=128))
    ref1 = _reference_sdpa(q, kt, v, attn_mask, True, scale)
    assert jnp.allclose(out1, ref1, atol=2e-2, rtol=2e-2), (
        float(jnp.max(jnp.abs(out1 - ref1))))

    out2 = jax.block_until_ready(
        fused_sdpa(q, kt, v, None, dropout_p=0.0, is_causal=False, scale=scale))
    ref2 = _reference_sdpa(q, kt, v, None, False, scale)
    assert jnp.allclose(out2, ref2, atol=2e-2, rtol=2e-2), (
        float(jnp.max(jnp.abs(out2 - ref2))))

    print("KERNEL_OK")
</pallas_src>

<mosaic_0001>
module attributes {stable_mosaic.version = 11 : i64} {
  func.func @_matmul_kernel(%arg0: i32, %arg1: i32, %arg2: i32, %arg3: i32, %arg4: i32, %arg5: memref<1x1x16x128xf32, #tpu.memory_space<vmem>>, %arg6: memref<1x1x128x128xf32, #tpu.memory_space<vmem>>, %arg7: memref<1x1x16x128xf32, #tpu.memory_space<vmem>>) attributes {dimension_semantics = [#tpu.dimension_semantics<parallel>, #tpu.dimension_semantics<parallel>, #tpu.dimension_semantics<parallel>, #tpu.dimension_semantics<parallel>, #tpu.dimension_semantics<arbitrary>], iteration_bounds = array<i64: 2, 4, 1, 1, 1>, scalar_prefetch = 0 : i64, scratch_operands = 0 : i64, tpu.core_type = #tpu.core_type<tc>, window_params = [{transform_indices = @transform_0, window_bounds = array<i64: 1, 1, 16, 128>}, {transform_indices = @transform_1, window_bounds = array<i64: 1, 1, 128, 128>}, {transform_indices = @transform_2, window_bounds = array<i64: 1, 1, 16, 128>}]} {
    %c0 = arith.constant 0 : index
    %c0_0 = arith.constant 0 : index
    %c0_1 = arith.constant 0 : index
    %c0_2 = arith.constant 0 : index
    %0 = vector.load %arg5[%c0, %c0_0, %c0_1, %c0_2] : memref<1x1x16x128xf32, #tpu.memory_space<vmem>>, vector<1x1x16x128xf32>
    %1 = vector.shape_cast %0 : vector<1x1x16x128xf32> to vector<16x128xf32>
    %c0_3 = arith.constant 0 : index
    %c0_4 = arith.constant 0 : index
    %c0_5 = arith.constant 0 : index
    %c0_6 = arith.constant 0 : index
    %2 = vector.load %arg6[%c0_3, %c0_4, %c0_5, %c0_6] : memref<1x1x128x128xf32, #tpu.memory_space<vmem>>, vector<1x1x128x128xf32>
    %3 = vector.shape_cast %2 : vector<1x1x128x128xf32> to vector<128x128xf32>
    %cst = arith.constant dense<0.000000e+00> : vector<16x128xf32>
    %4 = tpu.matmul %1, %3, %cst {dimension_numbers = #tpu.dot_dimension_numbers<[1], [0], [0], [1], [0, 0, 1, 1], [], []>} : vector<16x128xf32>, vector<128x128xf32>, vector<16x128xf32> -> vector<16x128xf32>
    %c0_7 = arith.constant 0 : index
    %c0_8 = arith.constant 0 : index
    %c0_9 = arith.constant 0 : index
    %c0_10 = arith.constant 0 : index
    %5 = vector.load %arg7[%c0_7, %c0_8, %c0_9, %c0_10] : memref<1x1x16x128xf32, #tpu.memory_space<vmem>>, vector<1x1x16x128xf32>
    %6 = vector.shape_cast %5 : vector<1x1x16x128xf32> to vector<16x128xf32>
    %7 = vector.shape_cast %4 : vector<16x128xf32> to vector<1x1x16x128xf32>
    tpu.vector_store %arg7[%c0_7, %c0_8, %c0_9, %c0_10], %7 {strides = array<i32>} : memref<1x1x16x128xf32, #tpu.memory_space<vmem>>, vector<1x1x16x128xf32>,
    return
  }
  func.func @transform_0(%arg0: i32, %arg1: i32, %arg2: i32, %arg3: i32, %arg4: i32) -> (i32, i32, i32, i32) {
    %c0_i32 = arith.constant 0 : i32
    return %arg0, %arg1, %arg2, %arg4 : i32, i32, i32, i32
  }
  func.func @transform_1(%arg0: i32, %arg1: i32, %arg2: i32, %arg3: i32, %arg4: i32) -> (i32, i32, i32, i32) {
    %c0_i32 = arith.constant 0 : i32
    %c0_i32_0 = arith.constant 0 : i32
    %c0_i32_1 = arith.constant 0 : i32
    return %c0_i32, %c0_i32_0, %arg4, %arg3 : i32, i32, i32, i32
  }
  func.func @transform_2(%arg0: i32, %arg1: i32, %arg2: i32, %arg3: i32, %arg4: i32) -> (i32, i32, i32, i32) {
    %c0_i32 = arith.constant 0 : i32
    return %arg0, %arg1, %arg2, %arg3 : i32, i32, i32, i32
  }
}

</mosaic_0001>

<bundles_post_ra>
// kernel: tpu_custom_call.1
= control target key start
LH: loop header
LB: loop body
LE: loop exit
PB: predicated region body
PF: predicated region fallthrough
CT: control target
= control target key end

     0   :  { %s1028_s0 = inlined_call_operand.hbm [shape: f32[2,4,16,128], index: 0, kind: input, shape index: {}]   ;;  %s1029_s1 = inlined_call_operand.hbm [shape: f32[1,1,128,128], index: 1, kind: input, shape index: {}]   ;;  %s1030_s2 = inlined_call_operand.hbm [shape: f32[2,4,16,128], index: 2, kind: output, shape index: {}]  }
   0x1   :  { %1037 = sst [smem:[#allocation14_spill]] %s1029_s1 }
   0x2   :  { %7 = vsyncpa [#allocation3], 0 }
   0x3   :  { %9 = vsyncpa [#allocation3 + $0x1], 0 }
   0x4   :  { %10 = vsyncpa [#allocation6], 0 }
   0x5   :  { %11 = vsyncpa [#allocation4], 0 }
   0x6   :  { %13 = vsyncpa [#allocation4 + $0x1], 0  ;;  %s817_s9 = smov 0   ;;  %s819_s10 = smov 0  }
   0x7   :  { %s821_s11 = smov 0   ;;  %s823_s12 = smov 0  }
   0x8   :  { %s825_s13 = smov 0   ;;  %s827_s14 = smov 0  }
   0x9   :  { %s829_s15 = smov 0   ;;  %s831_s16 = smov 0  }
   0xa LB: > { %1038 = sst [smem:[#allocation11_spill]] %s785_s14  ;;  %s474_s17 = sadd.s32 4294967295, %s793_s16   ;;  %s793_s16 = sphi %s831_s16, %s19_s16   ;;  %s789_s15 = sphi %s829_s15, %s1061_s15   ;;  %s785_s14 = sphi %s827_s14, %s1056_s14   ;;  %s781_s13 = sphi %s825_s13, %s1060_s13   ;;  %s777_s12 = sphi %s823_s12, %s1055_s12   ;;  %s773_s11 = sphi %s821_s11, %s1059_s11   ;;  %s769_s10 = sphi %s819_s10, %s1058_s10   ;;  %s765_s9 = sphi %s817_s9, %s1057_s9  }
   0xb   : > { %s475_s18 = sadd.s32 4294967294, %s793_s16   ;;  %p78_p0 = scmp.ne.s32.totalorder %s769_s10, %s765_s9 }
   0xc   : > { %p861_p1 = scmp.eq.s32.totalorder %s474_s17, 0  ;;  %p865_p2 = scmp.eq.s32.totalorder %s474_s17, 7 }
   0xd   : > { %p142_p3 = scmp.eq.s32.totalorder %s475_s18, 7  ;;  %p476_p5 = scmp.ge.s32.totalorder %s793_s16, 1 }
   0xe   : > { %p871_p4 = por %p861_p1, %p78_p0  ;;  %p149_p7 = scmp.lt.s32.totalorder %s793_s16, 9 }
   0xf   : > { %p876_p6 = por %p142_p3, %p78_p0  ;;  %s795_s24 = smov [#allocation5]  }
  0x10   : > { %s1041_s21 = scalar_select %p871_p4, 1, 0 }
  0x11   : > { %s1042_s22 = scalar_select %p876_p6, 1, 0 }
  0x12   : > { %p881_p8 = pnand %p476_p5, %p149_p7  ;;  %s165_s25 = sshll.u32 %s795_s24, 4  ;;  %s166_s25 = int_to_ptr.vmem [resolvable:$true] %s165_s25 }
  0x13   : > { %1043 = sst [smem:[#allocation12_spill]] %s1042_s22  ;;  %s650_s26 = scalar_lea.vmem %s166_s25, 2048 }
  0x14   : > { %p554_p9 = pneg %p881_p8  ;;  %p651_p12 = scmp.ne.s32.totalorder %s166_s25, %s650_s26 }
  0x15   : > { %p658_p3 = scmp.lt.s32.totalorder %s166_s25, %s166_s25  ;;  %p659_p6 = scmp.lt.s32.totalorder %s650_s26, %s650_s26 }
  0x16   : > { %p555_p10 = pnand %p554_p9, %p861_p1 }
  0x17   : > { %p660_p4 = por %p659_p6, %p658_p3 }
  0x18   : > { %p641_p11 = pneg %p555_p10 }
  0x1a   : > { %p653_p13 = pnand %p651_p12, %p641_p11 }
  0x1c   : > { %p654_p0 = pneg %p653_p13 }
  0x1e   : > { %p661_p5 = pnand %p660_p4, %p654_p0 }
  0x20   : > { %664 = shalt.err (!%p661_p5)
}
  0x21   : > { %s1032_s27 = smov 128   ;;  %s1033_s28 = smov 8  }
  0x22   : > { %s1045_s1 = sld [smem:[#allocation14_spill]]  ;;  %s48_s3 = sadd.s32 1, %s785_s14 }
  0x23   : > { %p50_p4 = scmp.ge.s32.totalorder %s48_s3, 4  ;;  %s52_s4 = sadd.s32 1, %s789_s15 }
  0x24   : > { %s65_s5 = sadd.s32 1, %s773_s11  ;;  %p72_p6 = scmp.ne.s32.totalorder %s773_s11, %s769_s10 }
  0x25   : > { %s1063_s3 = smov (%p50_p4, %s48_s3), 0  ;;  %s1065_s4 = smov (!%p50_p4, %s52_s4), %s789_s15 }
  0x26   : > { %1046 = sst [smem:[#allocation13_spill]] %s1063_s3  ;;  %s57_s6 = ssub.s32 %s785_s14, %s1063_s3 }
  0x27   : > { %p73_p7 = scmp.eq.s32.totalorder %s793_s16, 0  ;;  %p54_p9 = scmp.ge.s32.totalorder %s1065_s4, 2 }
  0x28   : > { %557 = dma.hbm_to_vmem [thread:$0]  (!%p555_p10), %s1045_s1, 2048, %s166_s25, [#allocation6], %s1032_s27, %s1032_s27, %s1033_s28  }
  0x29   : > { %p908_p11 = por %p865_p2, %p72_p6  ;;  %p912_p10 = por %p73_p7, %p72_p6 }
  0x2a   : > { %p567_p12 = scmp.lt.s32.totalorder %s793_s16, 8  ;;  %s1067_s4 = smov (%p54_p9, %s1065_s4), 0 }
  0x2b   : > { %s179_s17 = sand.u32 1, %s773_s11   ;;  %s480_s18 = sshll.u32 %s785_s14, 1 }
  0x2c   : > { %s56_s24 = ssub.s32 %s789_s15, %s1067_s4  ;;  %s479_s26 = sshll.u32 %s179_s17, 4 }
  0x2d   : > { %s58_s25 = sor.u32 %s57_s6, %s56_s24  ;;  %s481_s20 = sshll.u32 %s789_s15, 3 }
  0x2e   : > { %p63_p13 = scmp.eq.s32.totalorder %s58_s25, 0  ;;  %s183_s29 = scalar_lea.vmem [#allocation2], %s479_s26 }
  0x2f   : > { %s195_s30 = sshll.u32 %s183_s29, 4  ;;  %s192_s28 = sadd.s32 %s481_s20, %s480_s18  ;;  %s196_s30 = int_to_ptr.vmem [resolvable:$true] %s195_s30 }
  0x30   : > { %s925_s27 = scalar_select %p63_p13, %s773_s11, %s65_s5  }
  0x31   : > { %s482_s1 = sshll.u32 %s192_s28, 7  ;;  %p931_p2 = pnand %p567_p12, %p912_p10 }
  0x32   : > { %s194_s6 = scalar_lea.hbm %s1028_s0, %s482_s1  ;;  %s180_s24 = scalar_lea.sflag [#allocation3], %s179_s17 }
  0x33   : > { %p667_p0 = pneg %p931_p2  ;;  %s678_s25 = scalar_lea.vmem %s196_s30, 256 }
  0x34   : > { %p679_p3 = scmp.ne.s32.totalorder %s196_s30, %s678_s25  ;;  %s798_s5 = smov [#allocation2]  }
  0x35   : > { %s683_s28 = sshll.u32 %s798_s5, 4  ;;  %s684_s28 = int_to_ptr.vmem [resolvable:$false] %s683_s28 }
  0x36   : > { %p681_p5 = pnand %p679_p3, %p667_p0  ;;  %s685_s8 = scalar_lea.vmem %s684_s28, 512 }
  0x37   : > { %p686_p6 = scmp.lt.s32.totalorder %s196_s30, %s684_s28  ;;  %p687_p7 = scmp.lt.s32.totalorder %s685_s8, %s678_s25 }
  0x38   : > { %p682_p4 = pneg %p681_p5 }
  0x39   : > { %p688_p9 = por %p687_p7, %p686_p6 }
  0x3b   : > { %p689_p10 = pnand %p688_p9, %p682_p4 }
  0x3d   : > { %692 = shalt.err (!%p689_p10)
}
  0x3e   : > { %s1050_s14 = smov 8   ;;  %s1051_s1 = smov 128  }
  0x3f   : > { %561 = dma.hbm_to_vmem [thread:$0]  (!%p931_p2), %s194_s6, 256, %s196_s30, %s180_s24, %s1051_s1, %s1051_s1, %s1050_s14  }
  0x40   : > { %207 = sbr.rel (%p881_p8) target bundleno = 314 (0x13a), region = 28  ;;  %s948_s22 = sand.u32 (!%p881_p8), 1, %s769_s10  }
  0x41   : > { %s484_s17 = sshll.u32 (!%p881_p8), %s948_s22, 4  ;;  %s210_s18 = scalar_lea.sflag (!%p881_p8), [#allocation3], %s948_s22 }
  0x42   : > { %s954_s26 = scalar_lea.vmem (!%p881_p8), [#allocation2], %s484_s17  ;;  %p1052_p12 = scmp.ne.s32.totalorder (!%p881_p8), %s1041_s21, 0 }
  0x45   : > { %752 = dma.done.wait (%p1052_p12), %s210_s18, 256  }
  0x46   : > { %754 = vsyncadd (%p1052_p12), %s210_s18, 4294967040 }
  0x47   : > { %756 = dma.done.wait (%p861_p1), [#allocation6], 2048  }
  0x48   : > { %758 = vsyncadd (%p861_p1), [#allocation6], 4294965248  ;;  %v258_v0 = vld [vmem:[#allocation5 + $0x78] sm:$0xff]  ;;  %v257_v1 = vld [vmem:[#allocation5 + $0x70] sm:$0xff]  ;;  %s488_s19 = sshll.u32 %s777_s12, 1  ;;  %s489_s21 = sshll.u32 %s781_s13, 3 }
  0x49   : > { %511 = vmatprep.subr.mxu0 %v258_v0  ;;  %v256_v2 = vld [vmem:[#allocation5 + $0x68] sm:$0xff]  ;;  %v255_v3 = vld [vmem:[#allocation5 + $0x60] sm:$0xff]  ;;  %v254_v5 = vld [vmem:[#allocation5 + $0x58] sm:$0xff]  ;;  %s352_s23 = sadd.s32 %s489_s21, %s488_s19  ;;  %s237_s3 = scalar_lea.vmem [#allocation7], %s484_s17 }
  0x4a   : > { %512 = vmatpush3.msra.mxu0 %v258_v0  ;;  %v241_v4 = vld [vmem:[%s954_s26] sm:$0xff]  ;;  %v252_v7 = vld [vmem:[#allocation5 + $0x48] sm:$0xff]  ;;  %v250_v9 = vld [vmem:[#allocation5 + $0x38] sm:$0xff]  ;;  %s355_s20 = sshll.u32 %s237_s3, 4  ;;  %s490_s29 = sshll.u32 %s352_s23, 7  ;;  %s970_s20 = int_to_ptr.vmem [resolvable:$true] %s355_s20 }
  0x4b   : > { %513 = vmatprep.subr.mxu0 %v257_v1  ;;  %543 = vmatprep.mubr.f32.mxu0 %v241_v4  ;;  %v253_v6 = vld [vmem:[#allocation5 + $0x50] sm:$0xff]  ;;  %v251_v8 = vld [vmem:[#allocation5 + $0x40] sm:$0xff]  ;;  %v248_v11 = vld [vmem:[#allocation5 + $0x28] sm:$0xff]  ;;  %s975_s24 = scalar_lea.hbm %s1030_s2, %s490_s29  ;;  %s337_s12 = scalar_lea.sflag [#allocation4], %s948_s22 }
  0x4c   : > { %514 = vmatpush3.msra.mxu0 %v257_v1  ;;  %v249_v10 = vld [vmem:[#allocation5 + $0x30] sm:$0xff]  ;;  %v247_v12 = vld [vmem:[#allocation5 + $0x20] sm:$0xff]  ;;  %v246_v13 = vld [vmem:[#allocation5 + $0x18] sm:$0xff]  ;;  %s693_s13 = scalar_lea.vmem %s970_s20, 256  ;;  %s799_s25 = smov [#allocation7]  }
  0x4d   : > { %515 = vmatprep.subr.mxu0 %v256_v2  ;;  %v245_v14 = vld [vmem:[#allocation5 + $0x10] sm:$0xff]  ;;  %v244_v15 = vld [vmem:[#allocation5 + $0x8] sm:$0xff]  ;;  %v243_v16 = vld [vmem:[#allocation5] sm:$0xff]  ;;  %p694_p1 = scmp.ne.s32.totalorder %s970_s20, %s693_s13  ;;  %s697_s5 = sshll.u32 %s799_s25, 4  ;;  %s698_s5 = int_to_ptr.vmem [resolvable:$false] %s697_s5 }
  0x4e   : > { %516 = vmatpush3.msra.mxu0 %v256_v2  ;;  %v242_v17 = vld [vmem:[%s954_s26 + $0x8] sm:$0xff]  ;;  %s699_s28 = scalar_lea.vmem %s698_s5, 512  ;;  %p700_p2 = scmp.lt.s32.totalorder %s970_s20, %s698_s5 }
  0x4f   : > { %517 = vmatprep.subr.mxu0 %v255_v3  ;;  %p695_p8 = pnand %p694_p1, %p908_p11  ;;  %p701_p0 = scmp.lt.s32.totalorder %s699_s28, %s693_s13 }
  0x50   : > { %518 = vmatpush3.msra.mxu0 %v255_v3 }
  0x51   : > { %519 = vmatprep.subr.mxu0 %v254_v5  ;;  %p696_p13 = pneg %p695_p8  ;;  %p702_p3 = por %p701_p0, %p700_p2 }
  0x52   : > { %520 = vmatpush3.msra.mxu0 %v254_v5 }
  0x53   : > { %521 = vmatprep.subr.mxu0 %v253_v6  ;;  %p703_p5 = pnand %p702_p3, %p696_p13 }
  0x54   : > { %522 = vmatpush3.msra.mxu0 %v253_v6 }
  0x55   : > { %523 = vmatprep.subr.mxu0 %v252_v7 }
  0x56   : > { %524 = vmatpush3.msra.mxu0 %v252_v7 }
  0x57   : > { %525 = vmatprep.subr.mxu0 %v251_v8 }
  0x58   : > { %526 = vmatpush3.msra.mxu0 %v251_v8 }
  0x59   : > { %527 = vmatprep.subr.mxu0 %v250_v9 }
  0x5a   : > { %528 = vmatpush3.msra.mxu0 %v250_v9 }
  0x5b   : > { %529 = vmatprep.subr.mxu0 %v249_v10 }
  0x5c   : > { %530 = vmatpush3.msra.mxu0 %v249_v10 }
  0x5d   : > { %531 = vmatprep.subr.mxu0 %v248_v11 }
  0x5e   : > { %532 = vmatpush3.msra.mxu0 %v248_v11 }
  0x5f   : > { %533 = vmatprep.subr.mxu0 %v247_v12 }
  0x60   : > { %534 = vmatpush3.msra.mxu0 %v247_v12 }
  0x61   : > { %535 = vmatprep.subr.mxu0 %v246_v13 }
  0x62   : > { %536 = vmatpush3.msra.mxu0 %v246_v13 }
  0x63   : > { %537 = vmatprep.subr.mxu0 %v245_v14 }
  0x64   : > { %538 = vmatpush3.msra.mxu0 %v245_v14 }
  0x65   : > { %539 = vmatprep.subr.mxu0 %v244_v15 }
  0x66   : > { %540 = vmatpush3.msra.mxu0 %v244_v15 }
  0x67   : > { %541 = vmatprep.subr.mxu0 %v243_v16 }
  0x68   : > { %542 = vmatpush3.msra.mxu0 %v243_v16 }
  0x69   : > { %544 = vmatmul.mubr.f32.vlgmr.msra.gmra.mxu0 %v242_v17 }
 0x129   : > { %v545_v18 = vpop.f32.mrf.mxu0 }
 0x12a   : > { %335 = vst [vmem:[%s237_s3 + $0x8] sm:$0xff] %v545_v18 }
 0x12b   : > { %v325_v19 = vpop.f32.mrf.mxu0 }
 0x12c   : > { %334 = vst [vmem:[%s237_s3] sm:$0xff] %v325_v19 }
 0x12d   : > { %706 = shalt.err (!%p703_p5)
}
 0x12e   : > { %s707_s8 = scalar_lea.hbm %s975_s24, 256  ;;  %s711_s17 = scalar_lea.hbm %s1030_s2, 2048 }
 0x12f   : > { %p708_p4 = scmp.ne.s32.totalorder %s975_s24, %s707_s8  ;;  %p712_p9 = scmp.lt.s32.totalorder %s975_s24, %s1030_s2 }
 0x130   : > { %p713_p10 = scmp.lt.s32.totalorder %s711_s17, %s707_s8 }
 0x131   : > { %p709_p6 = pnand %p708_p4, %p908_p11 }
 0x132   : > { %p714_p12 = por %p713_p10, %p712_p9 }
 0x133   : > { %p710_p7 = pneg %p709_p6 }
 0x135   : > { %p715_p1 = pnand %p714_p12, %p710_p7 }
 0x137   : > { %718 = shalt.err (!%p715_p1)
}
 0x138   : > { %s800_s19 = smov 128   ;;  %s801_s21 = smov 8  }
 0x139   : > { %552 = dma.vmem_to_hbm [thread:$0]  (%p908_p11), %s970_s20, 256, %s975_s24, %s337_s12, %s800_s19, %s800_s19, %s801_s21  }
 0x13a PF: > { %s1053_s23 = sld [smem:[#allocation12_spill]]  ;;  %p569_p8 = scmp.ge.s32.totalorder %s793_s16, 2 }
 0x13b   : > { %s370_s3 = sand.u32 1, %s765_s9  }
 0x13c   : > { %s371_s29 = scalar_lea.sflag [#allocation4], %s370_s3 }
 0x140   : > { %p1054_p13 = scmp.ne.s32.totalorder %s1053_s23, 0 }
 0x142   : > { %p563_p2 = pnand %p569_p8, %p1054_p13 }
 0x144   : > { %p564_p0 = pneg %p563_p2 }
 0x146   : > { %760 = dma.done.wait (%p564_p0), %s371_s29, 256  }
 0x147   : > { %762 = vsyncadd (%p564_p0), %s371_s29, 4294967040  ;;  %s19_s16 = sadd.s32 1, %s793_s16   ;;  %s1055_s12 = sld [smem:[#allocation11_spill]] }
 0x148   : > { %p16_p3 = scmp.ge.s32.totalorder %s19_s16, 10   ;;  %s1056_s14 = sld [smem:[#allocation13_spill]] }
 0x149   : > { %s1057_s9 = smov %s769_s10  ;;  %s1058_s10 = smov %s773_s11 }
 0x14a   : > { %s1059_s11 = smov %s925_s27  ;;  %s1060_s13 = smov %s789_s15 }
 0x14b   : > { %s1061_s15 = smov %s1067_s4  ;;  %18 = sbr.rel (!%p16_p3) target bundleno = 10 (0xa), region = 78 }
 0x150   :  { %376 = vsyncpa [#allocation3], 1 }
 0x151   :  { %378 = vsyncpa [#allocation3 + $0x1], 1 }
 0x152   :  { %379 = vsyncpa [#allocation6], 1 }
 0x153   :  { %380 = vsyncpa [#allocation4], 1 }
 0x154   :  { %382 = vsyncpa [#allocation4 + $0x1], 1 }

</bundles_post_ra>
